<compile_context>
chip_gen: v5e
topology: v5e:2x2
jax: 0.10.0
libtpu: 0.0.40
codegen_flags: <defaults>
</compile_context>

<pallas_src>
import jax
import jax.numpy as jnp
from jax.experimental import pallas as pl
from jax.experimental.pallas import tpu as pltpu

LANE = 128
_MIN_SUBLANES = 8  # f32 sublane tile; use 16 if blocks are ever made bf16


def _round_up(v, m):
    return ((v + m - 1) // m) * m


def _pick_block_rows(nb, block_rows):
    """Sublane rows per grid step.

    Rows are a multiple of 8 (f32 tiling) and the block is capped so the grid
    has >= 2 steps whenever the batch allows it (keeps both v7x TensorCores
    fed under dimension_semantics=("parallel",); negligible cost on 1-TC chips).
    """
    if nb <= 2 * _MIN_SUBLANES:
        return nb  # single block, equal to the full array dim (allowed)
    br = min(block_rows,
             _round_up(nb, _MIN_SUBLANES),
             _round_up(pl.cdiv(nb, 2), _MIN_SUBLANES))
    return max(br, _MIN_SUBLANES)


def mlp_kernel(p_ref, x_ref, o_ref):
    """p_ref: (64,) f32 in SMEM -> [0:30]=w1[k,j] at k*10+j, [30:40]=b1,
                                    [40:50]=w2, [50]=b2.
    x_ref: (3, br, 128) input tile (feature index leading, batch dense on lanes).
    o_ref: (br, 128) output tile (lane-dense unmasked stores).
    """
    x0 = x_ref[0].astype(jnp.float32)
    x1 = x_ref[1].astype(jnp.float32)
    x2 = x_ref[2].astype(jnp.float32)
    y = None
    for j in range(10):                       # hidden units, fully unrolled
        # fc1 FMA chain with the bias folded in (no jnp.full splat init).
        h = p_ref[j] * x0
        h = h + p_ref[10 + j] * x1
        h = h + p_ref[20 + j] * x2
        h = h + p_ref[30 + j]                 # + b1[j]
        h = jnp.maximum(h, 0.0)               # ReLU
        t = p_ref[40 + j] * h                 # fc2 FMA
        y = t if y is None else y + t
    y = y + p_ref[50]                         # + b2
    o_ref[...] = y.astype(o_ref.dtype)


def _pack_params(w1, b1, w2, b2):
    """Pack the 41 parameters into one flat f32 array (padded to 64) for SMEM."""
    p = jnp.zeros((64,), jnp.float32)
    p = p.at[0:30].set(w1.astype(jnp.float32).reshape(-1))   # w1[k, j] -> k*10+j
    p = p.at[30:40].set(b1.astype(jnp.float32).reshape(-1))
    p = p.at[40:50].set(w2.astype(jnp.float32).reshape(-1))
    p = p.at[50:51].set(b2.astype(jnp.float32).reshape(-1))
    return p


def simple_nn_forward(x, w1, b1, w2, b2, *, block_rows=2048, feature_major=False,
                      out_dtype=None):
    """relu(x @ w1 + b1) @ w2 + b2  ->  (B, 1).

    x: (B, 3) by default, or (3, B) when feature_major=True (the fast path:
    with B % 128 == 0 the wrapper does zero extra HBM passes).
    w1: (3, 10), b1: (1, 10), w2: (10, 1), b2: (1, 1).
    """
    if feature_major:
        assert x.shape[0] == 3
        B = x.shape[1]
    else:
        assert x.shape[1] == 3
        B = x.shape[0]
    out_dtype = x.dtype if out_dtype is None else out_dtype

    Bp = _round_up(B, LANE)          # pad the batch only to a lane multiple
    nb = Bp // LANE                  # number of 128-wide batch rows
    br = _pick_block_rows(nb, block_rows)
    n_tiles = pl.cdiv(nb, br)        # ragged last block handled by Pallas

    if feature_major and Bp == B:
        xt = x.reshape(3, nb, LANE)  # free: contiguous reshape, no HBM pass
    else:
        # Exactly one fused transpose+pad pass; feeding feature-major,
        # 128-aligned batches upstream removes it entirely (review item).
        x_fm = x if feature_major else x.T
        xt = jnp.zeros((3, Bp), x.dtype).at[:, :B].set(x_fm).reshape(3, nb, LANE)

    p = _pack_params(w1, b1, w2, b2)

    out = pl.pallas_call(
        mlp_kernel,
        out_shape=jax.ShapeDtypeStruct((nb, LANE), out_dtype),
        grid=(n_tiles,),
        in_specs=[
            pl.BlockSpec(memory_space=pltpu.MemorySpace.SMEM),   # packed params
            pl.BlockSpec((3, br, LANE), lambda i: (0, i, 0)),    # x tile
        ],
        out_specs=pl.BlockSpec((br, LANE), lambda i: (i, 0)),
        compiler_params=pltpu.CompilerParams(
            dimension_semantics=("parallel",)),
    )(p, xt)

    flat = out.reshape(Bp)
    if Bp != B:
        flat = flat[:B]              # unpad copy only when B % 128 != 0
    return flat.reshape(B, 1)


def init_params(key):
    # nn.Linear shapes, stored pre-transposed:
    #   fc1: weight (10, 3), bias (10,) -> (3, 10), (1, 10)
    #   fc2: weight (1, 10), bias (1,)  -> (10, 1), (1, 1)
    k1, k2, k3, k4 = jax.random.split(key, 4)
    w1 = jax.random.normal(k1, (3, 10), jnp.float32) * 0.5
    b1 = jax.random.normal(k2, (1, 10), jnp.float32) * 0.1
    w2 = jax.random.normal(k3, (10, 1), jnp.float32) * 0.5
    b2 = jax.random.normal(k4, (1, 1), jnp.float32) * 0.1
    return w1, b1, w2, b2


if __name__ == "__main__":
    key = jax.random.PRNGKey(0)
    kx, kp = jax.random.split(key)
    w1, b1, w2, b2 = init_params(kp)

    def ref_fwd(xx):  # xx: (B, 3)
        h = jnp.maximum(
            jnp.dot(xx, w1, precision=jax.lax.Precision.HIGHEST) + b1, 0.0)
        return jnp.dot(h, w2, precision=jax.lax.Precision.HIGHEST) + b2

    # 1) Small batch-major case (single tile, sub-lane batch).
    x_small = jax.random.normal(kx, (8, 3), jnp.float32)
    out_small = jax.block_until_ready(simple_nn_forward(x_small, w1, b1, w2, b2))
    assert out_small.shape == (8, 1)
    assert jnp.allclose(out_small, ref_fwd(x_small), atol=1e-5, rtol=1e-5)

    # 2) Feature-major, 128-aligned batch: zero-copy fast path, >=2 grid steps
    #    (exercises the v7x megacore split of the batch grid).
    x_fm = jax.random.normal(jax.random.PRNGKey(1), (3, 4096), jnp.float32)
    out_fm = jax.block_until_ready(
        simple_nn_forward(x_fm, w1, b1, w2, b2, feature_major=True))
    assert out_fm.shape == (4096, 1)
    assert jnp.allclose(out_fm, ref_fwd(x_fm.T), atol=1e-5, rtol=1e-5)

    # 3) Unaligned batch-major case: exercises the fused pad+transpose pass,
    #    the ragged last grid block, multi-step pipelining, and the unpad slice.
    x_big = jax.random.normal(jax.random.PRNGKey(2), (5000, 3), jnp.float32)
    out_big = jax.block_until_ready(
        simple_nn_forward(x_big, w1, b1, w2, b2, block_rows=8))
    assert out_big.shape == (5000, 1)
    assert jnp.allclose(out_big, ref_fwd(x_big), atol=1e-5, rtol=1e-5)

    print("KERNEL_OK")
</pallas_src>

<mosaic_0001>
module attributes {stable_mosaic.version = 11 : i64} {
  func.func @mlp_kernel(%arg0: i32, %arg1: memref<64xf32, #tpu.memory_space<smem>>, %arg2: memref<3x1x128xf32, #tpu.memory_space<vmem>>, %arg3: memref<1x128xf32, #tpu.memory_space<vmem>>) attributes {dimension_semantics = [#tpu.dimension_semantics<parallel>], iteration_bounds = array<i64: 1>, scalar_prefetch = 0 : i64, scratch_operands = 0 : i64, tpu.core_type = #tpu.core_type<tc>, window_params = [{transform_indices = @transform_0, window_bounds = array<i64: 64>}, {transform_indices = @transform_1, window_bounds = array<i64: 3, 1, 128>}, {transform_indices = @transform_2, window_bounds = array<i64: 1, 128>}]} {
    %c0 = arith.constant 0 : index
    %c0_0 = arith.constant 0 : index
    %c0_1 = arith.constant 0 : index
    %0 = vector.load %arg2[%c0, %c0_0, %c0_1] : memref<3x1x128xf32, #tpu.memory_space<vmem>>, vector<1x1x128xf32>
    %1 = vector.shape_cast %0 : vector<1x1x128xf32> to vector<1x128xf32>
    %c1 = arith.constant 1 : index
    %c0_2 = arith.constant 0 : index
    %c0_3 = arith.constant 0 : index
    %2 = vector.load %arg2[%c1, %c0_2, %c0_3] : memref<3x1x128xf32, #tpu.memory_space<vmem>>, vector<1x1x128xf32>
    %3 = vector.shape_cast %2 : vector<1x1x128xf32> to vector<1x128xf32>
    %c2 = arith.constant 2 : index
    %c0_4 = arith.constant 0 : index
    %c0_5 = arith.constant 0 : index
    %4 = vector.load %arg2[%c2, %c0_4, %c0_5] : memref<3x1x128xf32, #tpu.memory_space<vmem>>, vector<1x1x128xf32>
    %5 = vector.shape_cast %4 : vector<1x1x128xf32> to vector<1x128xf32>
    %c0_6 = arith.constant 0 : index
    %6 = memref.load %arg1[%c0_6] : memref<64xf32, #tpu.memory_space<smem>>
    %7 = vector.broadcast %6 : f32 to vector<1x128xf32>
    %8 = arith.mulf %7, %1 : vector<1x128xf32>
    %c10 = arith.constant 10 : index
    %9 = memref.load %arg1[%c10] : memref<64xf32, #tpu.memory_space<smem>>
    %10 = vector.broadcast %9 : f32 to vector<1x128xf32>
    %11 = arith.mulf %10, %3 : vector<1x128xf32>
    %12 = arith.addf %8, %11 : vector<1x128xf32>
    %c20 = arith.constant 20 : index
    %13 = memref.load %arg1[%c20] : memref<64xf32, #tpu.memory_space<smem>>
    %14 = vector.broadcast %13 : f32 to vector<1x128xf32>
    %15 = arith.mulf %14, %5 : vector<1x128xf32>
    %16 = arith.addf %12, %15 : vector<1x128xf32>
    %c30 = arith.constant 30 : index
    %17 = memref.load %arg1[%c30] : memref<64xf32, #tpu.memory_space<smem>>
    %18 = vector.broadcast %17 : f32 to vector<1x128xf32>
    %19 = arith.addf %16, %18 : vector<1x128xf32>
    %cst = arith.constant 0.000000e+00 : f32
    %20 = vector.broadcast %cst : f32 to vector<1x128xf32>
    %21 = arith.maximumf %19, %20 : vector<1x128xf32>
    %c40 = arith.constant 40 : index
    %22 = memref.load %arg1[%c40] : memref<64xf32, #tpu.memory_space<smem>>
    %23 = vector.broadcast %22 : f32 to vector<1x128xf32>
    %24 = arith.mulf %23, %21 : vector<1x128xf32>
    %c1_7 = arith.constant 1 : index
    %25 = memref.load %arg1[%c1_7] : memref<64xf32, #tpu.memory_space<smem>>
    %26 = vector.broadcast %25 : f32 to vector<1x128xf32>
    %27 = arith.mulf %26, %1 : vector<1x128xf32>
    %c11 = arith.constant 11 : index
    %28 = memref.load %arg1[%c11] : memref<64xf32, #tpu.memory_space<smem>>
    %29 = vector.broadcast %28 : f32 to vector<1x128xf32>
    %30 = arith.mulf %29, %3 : vector<1x128xf32>
    %31 = arith.addf %27, %30 : vector<1x128xf32>
    %c21 = arith.constant 21 : index
    %32 = memref.load %arg1[%c21] : memref<64xf32, #tpu.memory_space<smem>>
    %33 = vector.broadcast %32 : f32 to vector<1x128xf32>
    %34 = arith.mulf %33, %5 : vector<1x128xf32>
    %35 = arith.addf %31, %34 : vector<1x128xf32>
    %c31 = arith.constant 31 : index
    %36 = memref.load %arg1[%c31] : memref<64xf32, #tpu.memory_space<smem>>
    %37 = vector.broadcast %36 : f32 to vector<1x128xf32>
    %38 = arith.addf %35, %37 : vector<1x128xf32>
    %cst_8 = arith.constant 0.000000e+00 : f32
    %39 = vector.broadcast %cst_8 : f32 to vector<1x128xf32>
    %40 = arith.maximumf %38, %39 : vector<1x128xf32>
    %c41 = arith.constant 41 : index
    %41 = memref.load %arg1[%c41] : memref<64xf32, #tpu.memory_space<smem>>
    %42 = vector.broadcast %41 : f32 to vector<1x128xf32>
    %43 = arith.mulf %42, %40 : vector<1x128xf32>
    %44 = arith.addf %24, %43 : vector<1x128xf32>
    %c2_9 = arith.constant 2 : index
    %45 = memref.load %arg1[%c2_9] : memref<64xf32, #tpu.memory_space<smem>>
    %46 = vector.broadcast %45 : f32 to vector<1x128xf32>
    %47 = arith.mulf %46, %1 : vector<1x128xf32>
    %c12 = arith.constant 12 : index
    %48 = memref.load %arg1[%c12] : memref<64xf32, #tpu.memory_space<smem>>
    %49 = vector.broadcast %48 : f32 to vector<1x128xf32>
    %50 = arith.mulf %49, %3 : vector<1x128xf32>
    %51 = arith.addf %47, %50 : vector<1x128xf32>
    %c22 = arith.constant 22 : index
    %52 = memref.load %arg1[%c22] : memref<64xf32, #tpu.memory_space<smem>>
    %53 = vector.broadcast %52 : f32 to vector<1x128xf32>
    %54 = arith.mulf %53, %5 : vector<1x128xf32>
    %55 = arith.addf %51, %54 : vector<1x128xf32>
    %c32 = arith.constant 32 : index
    %56 = memref.load %arg1[%c32] : memref<64xf32, #tpu.memory_space<smem>>
    %57 = vector.broadcast %56 : f32 to vector<1x128xf32>
    %58 = arith.addf %55, %57 : vector<1x128xf32>
    %cst_10 = arith.constant 0.000000e+00 : f32
    %59 = vector.broadcast %cst_10 : f32 to vector<1x128xf32>
    %60 = arith.maximumf %58, %59 : vector<1x128xf32>
    %c42 = arith.constant 42 : index
    %61 = memref.load %arg1[%c42] : memref<64xf32, #tpu.memory_space<smem>>
    %62 = vector.broadcast %61 : f32 to vector<1x128xf32>
    %63 = arith.mulf %62, %60 : vector<1x128xf32>
    %64 = arith.addf %44, %63 : vector<1x128xf32>
    %c3 = arith.constant 3 : index
    %65 = memref.load %arg1[%c3] : memref<64xf32, #tpu.memory_space<smem>>
    %66 = vector.broadcast %65 : f32 to vector<1x128xf32>
    %67 = arith.mulf %66, %1 : vector<1x128xf32>
    %c13 = arith.constant 13 : index
    %68 = memref.load %arg1[%c13] : memref<64xf32, #tpu.memory_space<smem>>
    %69 = vector.broadcast %68 : f32 to vector<1x128xf32>
    %70 = arith.mulf %69, %3 : vector<1x128xf32>
    %71 = arith.addf %67, %70 : vector<1x128xf32>
    %c23 = arith.constant 23 : index
    %72 = memref.load %arg1[%c23] : memref<64xf32, #tpu.memory_space<smem>>
    %73 = vector.broadcast %72 : f32 to vector<1x128xf32>
    %74 = arith.mulf %73, %5 : vector<1x128xf32>
    %75 = arith.addf %71, %74 : vector<1x128xf32>
    %c33 = arith.constant 33 : index
    %76 = memref.load %arg1[%c33] : memref<64xf32, #tpu.memory_space<smem>>
    %77 = vector.broadcast %76 : f32 to vector<1x128xf32>
    %78 = arith.addf %75, %77 : vector<1x128xf32>
    %cst_11 = arith.constant 0.000000e+00 : f32
    %79 = vector.broadcast %cst_11 : f32 to vector<1x128xf32>
    %80 = arith.maximumf %78, %79 : vector<1x128xf32>
    %c43 = arith.constant 43 : index
    %81 = memref.load %arg1[%c43] : memref<64xf32, #tpu.memory_space<smem>>
    %82 = vector.broadcast %81 : f32 to vector<1x128xf32>
    %83 = arith.mulf %82, %80 : vector<1x128xf32>
    %84 = arith.addf %64, %83 : vector<1x128xf32>
    %c4 = arith.constant 4 : index
    %85 = memref.load %arg1[%c4] : memref<64xf32, #tpu.memory_space<smem>>
    %86 = vector.broadcast %85 : f32 to vector<1x128xf32>
    %87 = arith.mulf %86, %1 : vector<1x128xf32>
    %c14 = arith.constant 14 : index
    %88 = memref.load %arg1[%c14] : memref<64xf32, #tpu.memory_space<smem>>
    %89 = vector.broadcast %88 : f32 to vector<1x128xf32>
    %90 = arith.mulf %89, %3 : vector<1x128xf32>
    %91 = arith.addf %87, %90 : vector<1x128xf32>
    %c24 = arith.constant 24 : index
    %92 = memref.load %arg1[%c24] : memref<64xf32, #tpu.memory_space<smem>>
    %93 = vector.broadcast %92 : f32 to vector<1x128xf32>
    %94 = arith.mulf %93, %5 : vector<1x128xf32>
    %95 = arith.addf %91, %94 : vector<1x128xf32>
    %c34 = arith.constant 34 : index
    %96 = memref.load %arg1[%c34] : memref<64xf32, #tpu.memory_space<smem>>
    %97 = vector.broadcast %96 : f32 to vector<1x128xf32>
    %98 = arith.addf %95, %97 : vector<1x128xf32>
    %cst_12 = arith.constant 0.000000e+00 : f32
    %99 = vector.broadcast %cst_12 : f32 to vector<1x128xf32>
    %100 = arith.maximumf %98, %99 : vector<1x128xf32>
    %c44 = arith.constant 44 : index
    %101 = memref.load %arg1[%c44] : memref<64xf32, #tpu.memory_space<smem>>
    %102 = vector.broadcast %101 : f32 to vector<1x128xf32>
    %103 = arith.mulf %102, %100 : vector<1x128xf32>
    %104 = arith.addf %84, %103 : vector<1x128xf32>
    %c5 = arith.constant 5 : index
    %105 = memref.load %arg1[%c5] : memref<64xf32, #tpu.memory_space<smem>>
    %106 = vector.broadcast %105 : f32 to vector<1x128xf32>
    %107 = arith.mulf %106, %1 : vector<1x128xf32>
    %c15 = arith.constant 15 : index
    %108 = memref.load %arg1[%c15] : memref<64xf32, #tpu.memory_space<smem>>
    %109 = vector.broadcast %108 : f32 to vector<1x128xf32>
    %110 = arith.mulf %109, %3 : vector<1x128xf32>
    %111 = arith.addf %107, %110 : vector<1x128xf32>
    %c25 = arith.constant 25 : index
    %112 = memref.load %arg1[%c25] : memref<64xf32, #tpu.memory_space<smem>>
    %113 = vector.broadcast %112 : f32 to vector<1x128xf32>
    %114 = arith.mulf %113, %5 : vector<1x128xf32>
    %115 = arith.addf %111, %114 : vector<1x128xf32>
    %c35 = arith.constant 35 : index
    %116 = memref.load %arg1[%c35] : memref<64xf32, #tpu.memory_space<smem>>
    %117 = vector.broadcast %116 : f32 to vector<1x128xf32>
    %118 = arith.addf %115, %117 : vector<1x128xf32>
    %cst_13 = arith.constant 0.000000e+00 : f32
    %119 = vector.broadcast %cst_13 : f32 to vector<1x128xf32>
    %120 = arith.maximumf %118, %119 : vector<1x128xf32>
    %c45 = arith.constant 45 : index
    %121 = memref.load %arg1[%c45] : memref<64xf32, #tpu.memory_space<smem>>
    %122 = vector.broadcast %121 : f32 to vector<1x128xf32>
    %123 = arith.mulf %122, %120 : vector<1x128xf32>
    %124 = arith.addf %104, %123 : vector<1x128xf32>
    %c6 = arith.constant 6 : index
    %125 = memref.load %arg1[%c6] : memref<64xf32, #tpu.memory_space<smem>>
    %126 = vector.broadcast %125 : f32 to vector<1x128xf32>
    %127 = arith.mulf %126, %1 : vector<1x128xf32>
    %c16 = arith.constant 16 : index
    %128 = memref.load %arg1[%c16] : memref<64xf32, #tpu.memory_space<smem>>
    %129 = vector.broadcast %128 : f32 to vector<1x128xf32>
    %130 = arith.mulf %129, %3 : vector<1x128xf32>
    %131 = arith.addf %127, %130 : vector<1x128xf32>
    %c26 = arith.constant 26 : index
    %132 = memref.load %arg1[%c26] : memref<64xf32, #tpu.memory_space<smem>>
    %133 = vector.broadcast %132 : f32 to vector<1x128xf32>
    %134 = arith.mulf %133, %5 : vector<1x128xf32>
    %135 = arith.addf %131, %134 : vector<1x128xf32>
    %c36 = arith.constant 36 : index
    %136 = memref.load %arg1[%c36] : memref<64xf32, #tpu.memory_space<smem>>
    %137 = vector.broadcast %136 : f32 to vector<1x128xf32>
    %138 = arith.addf %135, %137 : vector<1x128xf32>
    %cst_14 = arith.constant 0.000000e+00 : f32
    %139 = vector.broadcast %cst_14 : f32 to vector<1x128xf32>
    %140 = arith.maximumf %138, %139 : vector<1x128xf32>
    %c46 = arith.constant 46 : index
    %141 = memref.load %arg1[%c46] : memref<64xf32, #tpu.memory_space<smem>>
    %142 = vector.broadcast %141 : f32 to vector<1x128xf32>
    %143 = arith.mulf %142, %140 : vector<1x128xf32>
    %144 = arith.addf %124, %143 : vector<1x128xf32>
    %c7 = arith.constant 7 : index
    %145 = memref.load %arg1[%c7] : memref<64xf32, #tpu.memory_space<smem>>
    %146 = vector.broadcast %145 : f32 to vector<1x128xf32>
    %147 = arith.mulf %146, %1 : vector<1x128xf32>
    %c17 = arith.constant 17 : index
    %148 = memref.load %arg1[%c17] : memref<64xf32, #tpu.memory_space<smem>>
    %149 = vector.broadcast %148 : f32 to vector<1x128xf32>
    %150 = arith.mulf %149, %3 : vector<1x128xf32>
    %151 = arith.addf %147, %150 : vector<1x128xf32>
    %c27 = arith.constant 27 : index
    %152 = memref.load %arg1[%c27] : memref<64xf32, #tpu.memory_space<smem>>
    %153 = vector.broadcast %152 : f32 to vector<1x128xf32>
    %154 = arith.mulf %153, %5 : vector<1x128xf32>
    %155 = arith.addf %151, %154 : vector<1x128xf32>
    %c37 = arith.constant 37 : index
    %156 = memref.load %arg1[%c37] : memref<64xf32, #tpu.memory_space<smem>>
    %157 = vector.broadcast %156 : f32 to vector<1x128xf32>
    %158 = arith.addf %155, %157 : vector<1x128xf32>
    %cst_15 = arith.constant 0.000000e+00 : f32
    %159 = vector.broadcast %cst_15 : f32 to vector<1x128xf32>
    %160 = arith.maximumf %158, %159 : vector<1x128xf32>
    %c47 = arith.constant 47 : index
    %161 = memref.load %arg1[%c47] : memref<64xf32, #tpu.memory_space<smem>>
    %162 = vector.broadcast %161 : f32 to vector<1x128xf32>
    %163 = arith.mulf %162, %160 : vector<1x128xf32>
    %164 = arith.addf %144, %163 : vector<1x128xf32>
    %c8 = arith.constant 8 : index
    %165 = memref.load %arg1[%c8] : memref<64xf32, #tpu.memory_space<smem>>
    %166 = vector.broadcast %165 : f32 to vector<1x128xf32>
    %167 = arith.mulf %166, %1 : vector<1x128xf32>
    %c18 = arith.constant 18 : index
    %168 = memref.load %arg1[%c18] : memref<64xf32, #tpu.memory_space<smem>>
    %169 = vector.broadcast %168 : f32 to vector<1x128xf32>
    %170 = arith.mulf %169, %3 : vector<1x128xf32>
    %171 = arith.addf %167, %170 : vector<1x128xf32>
    %c28 = arith.constant 28 : index
    %172 = memref.load %arg1[%c28] : memref<64xf32, #tpu.memory_space<smem>>
    %173 = vector.broadcast %172 : f32 to vector<1x128xf32>
    %174 = arith.mulf %173, %5 : vector<1x128xf32>
    %175 = arith.addf %171, %174 : vector<1x128xf32>
    %c38 = arith.constant 38 : index
    %176 = memref.load %arg1[%c38] : memref<64xf32, #tpu.memory_space<smem>>
    %177 = vector.broadcast %176 : f32 to vector<1x128xf32>
    %178 = arith.addf %175, %177 : vector<1x128xf32>
    %cst_16 = arith.constant 0.000000e+00 : f32
    %179 = vector.broadcast %cst_16 : f32 to vector<1x128xf32>
    %180 = arith.maximumf %178, %179 : vector<1x128xf32>
    %c48 = arith.constant 48 : index
    %181 = memref.load %arg1[%c48] : memref<64xf32, #tpu.memory_space<smem>>
    %182 = vector.broadcast %181 : f32 to vector<1x128xf32>
    %183 = arith.mulf %182, %180 : vector<1x128xf32>
    %184 = arith.addf %164, %183 : vector<1x128xf32>
    %c9 = arith.constant 9 : index
    %185 = memref.load %arg1[%c9] : memref<64xf32, #tpu.memory_space<smem>>
    %186 = vector.broadcast %185 : f32 to vector<1x128xf32>
    %187 = arith.mulf %186, %1 : vector<1x128xf32>
    %c19 = arith.constant 19 : index
    %188 = memref.load %arg1[%c19] : memref<64xf32, #tpu.memory_space<smem>>
    %189 = vector.broadcast %188 : f32 to vector<1x128xf32>
    %190 = arith.mulf %189, %3 : vector<1x128xf32>
    %191 = arith.addf %187, %190 : vector<1x128xf32>
    %c29 = arith.constant 29 : index
    %192 = memref.load %arg1[%c29] : memref<64xf32, #tpu.memory_space<smem>>
    %193 = vector.broadcast %192 : f32 to vector<1x128xf32>
    %194 = arith.mulf %193, %5 : vector<1x128xf32>
    %195 = arith.addf %191, %194 : vector<1x128xf32>
    %c39 = arith.constant 39 : index
    %196 = memref.load %arg1[%c39] : memref<64xf32, #tpu.memory_space<smem>>
    %197 = vector.broadcast %196 : f32 to vector<1x128xf32>
    %198 = arith.addf %195, %197 : vector<1x128xf32>
    %cst_17 = arith.constant 0.000000e+00 : f32
    %199 = vector.broadcast %cst_17 : f32 to vector<1x128xf32>
    %200 = arith.maximumf %198, %199 : vector<1x128xf32>
    %c49 = arith.constant 49 : index
    %201 = memref.load %arg1[%c49] : memref<64xf32, #tpu.memory_space<smem>>
    %202 = vector.broadcast %201 : f32 to vector<1x128xf32>
    %203 = arith.mulf %202, %200 : vector<1x128xf32>
    %204 = arith.addf %184, %203 : vector<1x128xf32>
    %c50 = arith.constant 50 : index
    %205 = memref.load %arg1[%c50] : memref<64xf32, #tpu.memory_space<smem>>
    %206 = vector.broadcast %205 : f32 to vector<1x128xf32>
    %207 = arith.addf %204, %206 : vector<1x128xf32>
    %c0_18 = arith.constant 0 : index
    %c0_19 = arith.constant 0 : index
    %208 = vector.load %arg3[%c0_18, %c0_19] : memref<1x128xf32, #tpu.memory_space<vmem>>, vector<1x128xf32>
    tpu.vector_store %arg3[%c0_18, %c0_19], %207 {strides = array<i32>} : memref<1x128xf32, #tpu.memory_space<vmem>>, vector<1x128xf32>,
    return
  }
  func.func @transform_0(%arg0: i32) -> i32 {
    %c0_i32 = arith.constant 0 : i32
    %c0_i32_0 = arith.constant 0 : i32
    return %c0_i32 : i32
  }
  func.func @transform_1(%arg0: i32) -> (i32, i32, i32) {
    %c0_i32 = arith.constant 0 : i32
    %c0_i32_0 = arith.constant 0 : i32
    %c0_i32_1 = arith.constant 0 : i32
    return %c0_i32, %arg0, %c0_i32_0 : i32, i32, i32
  }
  func.func @transform_2(%arg0: i32) -> (i32, i32) {
    %c0_i32 = arith.constant 0 : i32
    %c0_i32_0 = arith.constant 0 : i32
    return %arg0, %c0_i32 : i32, i32
  }
}

</mosaic_0001>

<bundles_post_ra>
// kernel: tpu_custom_call.1
= control target key start
LH: loop header
LB: loop body
LE: loop exit
PB: predicated region body
PF: predicated region fallthrough
CT: control target
= control target key end

     0   :  { %7 = vsyncpa [#allocation5], 0  ;;  %s494_s0 = inlined_call_operand.hbm [shape: f32[64], index: 0, kind: input, shape index: {}]   ;;  %s495_s1 = inlined_call_operand.hbm [shape: f32[3,1,128], index: 1, kind: input, shape index: {}]   ;;  %s496_s2 = inlined_call_operand.hbm [shape: f32[1,128], index: 2, kind: output, shape index: {}]  }
   0x1   :  { %8 = vsyncpa [#allocation3], 0 }
   0x2   :  { %9 = vsyncpa [#allocation4], 0  ;;  %s15_s11 = sshll.u32 %s494_s0, 4  ;;  %s23_s14 = sshll.u32 %s495_s1, 4  ;;  %s16_s11 = int_to_ptr.hbm [resolvable:$true] %s15_s11  ;;  %s24_s14 = int_to_ptr.hbm [resolvable:$true] %s23_s14 }
   0x3   :  { %s378_s15 = smov [#allocation2]   ;;  %s379_s16 = smov [#allocation6]  }
   0x4   :  { %18 = dma.hbm_to_smem %s16_s11, 16, %s378_s15, [#allocation5]  }
   0x5   :  { %s25_s17 = sshll.u32 %s379_s16, 4  ;;  %s380_s18 = smov 16   ;;  %s26_s17 = int_to_ptr.vmem [resolvable:$true] %s25_s17 }
   0x6   :  { %s381_s19 = smov 1  }
   0x7   :  { %31 = dma.hbm_to_vmem [thread:$0]  %s24_s14, 48, %s26_s17, [#allocation3], %s380_s18, %s380_s18, %s381_s19  }
   0x8   :  { %372 = dma.done.wait [#allocation5], 16  }
   0x9   :  { %373 = vsyncadd [#allocation5], 4294967280 }
   0xa   :  { %374 = dma.done.wait [#allocation3], 48  }
   0xb   :  { %375 = vsyncadd [#allocation3], 4294967248 }
   0xc   :  { %40 = sfence }
   0xd   :  { %s46_s0 = sld [smem:[#allocation2]]  ;;  %v406_v0 = vld [vmem:[#allocation6] sm:$0x1]  ;;  %v410_v1 = vld [vmem:[#allocation6 + $0x1] sm:$0x1] }
   0xe   :  { %s257_s20 = sld [smem:[#allocation2 + $0xa]]  ;;  %v412_v2 = vld [vmem:[#allocation6 + $0x2] sm:$0x1] }
   0xf   :  { %s258_s21 = sld [smem:[#allocation2 + $0x14]] }
  0x10   :  { %s404_s22 = sld [smem:[#allocation2 + $0x1e]] }
  0x11   :  { %s408_s1 = sld [smem:[#allocation2 + $0x28]] }
  0x12   :  { %s261_s23 = sld [smem:[#allocation2 + $0x1]] }
  0x13   :  { %v47_v3 = vstv %s46_s0  ;;  %s262_s24 = sld [smem:[#allocation2 + $0xb]] }
  0x14   :  { %v48_v4 = vmul.f32 %v47_v3, %v406_v0  ;;  %v50_v5 = vstv %s257_s20  ;;  %s263_s25 = sld [smem:[#allocation2 + $0x15]] }
  0x15   :  { %v51_v6 = vmul.f32 %v50_v5, %v410_v1  ;;  %v54_v7 = vstv %s258_s21  ;;  %s264_s26 = sld [smem:[#allocation2 + $0x1f]] }
  0x16   :  { %v55_v8 = vmul.f32 %v54_v7, %v412_v2  ;;  %s417_s27 = sld [smem:[#allocation2 + $0x29]]  ;;  %v58_v16 = vstv %s404_s22 }
  0x17   :  { %v52_v9 = vadd.f32 %v51_v6, %v48_v4  ;;  %s266_s28 = sld [smem:[#allocation2 + $0x2]]  ;;  %v62_v37 = vstv %s408_s1 }
  0x18   :  { %v65_v10 = vstv %s261_s23  ;;  %s267_s29 = sld [smem:[#allocation2 + $0xc]] }
  0x19   :  { %v66_v11 = vmul.f32 %v65_v10, %v406_v0  ;;  %v68_v12 = vstv %s262_s24  ;;  %s268_s30 = sld [smem:[#allocation2 + $0x16]]  ;;  %v56_v13 = vadd.f32 %v55_v8, %v52_v9 }
  0x1a   :  { %v69_v14 = vmul.f32 %v68_v12, %v410_v1  ;;  %v72_v15 = vstv %s263_s25  ;;  %s421_s3 = sld [smem:[#allocation2 + $0x20]] }
  0x1b   :  { %v73_v17 = vmul.f32 %v72_v15, %v412_v2  ;;  %s425_s4 = sld [smem:[#allocation2 + $0x2a]]  ;;  %v76_v19 = vstv %s264_s26  ;;  %v59_v21 = vadd.f32 %v58_v16, %v56_v13 }
  0x1c   :  { %v70_v18 = vadd.f32 %v69_v14, %v66_v11  ;;  %s271_s5 = sld [smem:[#allocation2 + $0x3]]  ;;  %v80_v38 = vstv %s417_s27 }
  0x1d   :  { %v84_v20 = vstv %s266_s28  ;;  %s272_s6 = sld [smem:[#allocation2 + $0xd]]  ;;  %v60_v30 = vmax.f32 %v59_v21, 0.0 }
  0x1e   :  { %v74_v22 = vadd.f32 %v73_v17, %v70_v18  ;;  %v85_v23 = vmul.f32 %v84_v20, %v406_v0  ;;  %v87_v24 = vstv %s267_s29  ;;  %s273_s7 = sld [smem:[#allocation2 + $0x17]] }
  0x1f   :  { %v88_v25 = vmul.f32 %v87_v24, %v410_v1  ;;  %v91_v26 = vstv %s268_s30  ;;  %s429_s8 = sld [smem:[#allocation2 + $0x21]]  ;;  %v63_v44 = vmul.f32 %v62_v37, %v60_v30 }
  0x20   :  { %v77_v27 = vadd.f32 %v76_v19, %v74_v22  ;;  %v92_v28 = vmul.f32 %v91_v26, %v412_v2  ;;  %s432_s9 = sld [smem:[#allocation2 + $0x2b]]  ;;  %v95_v31 = vstv %s421_s3 }
  0x21   :  { %v89_v29 = vadd.f32 %v88_v25, %v85_v23  ;;  %s276_s10 = sld [smem:[#allocation2 + $0x4]]  ;;  %v99_v52 = vstv %s425_s4 }
  0x22   :  { %v103_v32 = vstv %s271_s5  ;;  %s277_s11 = sld [smem:[#allocation2 + $0xe]]  ;;  %v78_v33 = vmax.f32 %v77_v27, 0.0 }
  0x23   :  { %v93_v34 = vadd.f32 %v92_v28, %v89_v29  ;;  %v104_v35 = vmul.f32 %v103_v32, %v406_v0  ;;  %v106_v36 = vstv %s272_s6  ;;  %s278_s12 = sld [smem:[#allocation2 + $0x18]] }
  0x24   :  { %v107_v39 = vmul.f32 %v106_v36, %v410_v1  ;;  %v110_v40 = vstv %s273_s7  ;;  %s439_s13 = sld [smem:[#allocation2 + $0x22]]  ;;  %v81_v45 = vmul.f32 %v80_v38, %v78_v33 }
  0x25   :  { %v96_v41 = vadd.f32 %v95_v31, %v93_v34  ;;  %v111_v42 = vmul.f32 %v110_v40, %v412_v2  ;;  %s442_s14 = sld [smem:[#allocation2 + $0x2c]]  ;;  %v114_v46 = vstv %s429_s8 }
  0x26   :  { %v108_v43 = vadd.f32 %v107_v39, %v104_v35  ;;  %s281_s15 = sld [smem:[#allocation2 + $0x5]]  ;;  %v82_v58 = vadd.f32 %v81_v45, %v63_v44  ;;  %v118_v5 = vstv %s432_s9 }
  0x27   :  { %v122_v47 = vstv %s276_s10  ;;  %s282_s16 = sld [smem:[#allocation2 + $0xf]]  ;;  %v97_v48 = vmax.f32 %v96_v41, 0.0 }
  0x28   :  { %v112_v49 = vadd.f32 %v111_v42, %v108_v43  ;;  %v123_v50 = vmul.f32 %v122_v47, %v406_v0  ;;  %v125_v51 = vstv %s277_s11  ;;  %s283_s17 = sld [smem:[#allocation2 + $0x19]]  ;;  %s382_s11 = smov [#allocation7]  }
  0x29   :  { %v126_v53 = vmul.f32 %v125_v51, %v410_v1  ;;  %v129_v54 = vstv %s278_s12  ;;  %s448_s18 = sld [smem:[#allocation2 + $0x23]]  ;;  %v100_v59 = vmul.f32 %v99_v52, %v97_v48  ;;  %s244_s12 = sshll.u32 %s382_s11, 4  ;;  %s245_s12 = int_to_ptr.vmem [resolvable:$true] %s244_s12 }
  0x2a   :  { %v115_v55 = vadd.f32 %v114_v46, %v112_v49  ;;  %v130_v56 = vmul.f32 %v129_v54, %v412_v2  ;;  %s451_s19 = sld [smem:[#allocation2 + $0x2d]]  ;;  %v133_v60 = vstv %s439_s13 }
  0x2b   :  { %v127_v57 = vadd.f32 %v126_v53, %v123_v50  ;;  %s286_s0 = sld [smem:[#allocation2 + $0x6]]  ;;  %v101_v11 = vadd.f32 %v100_v59, %v82_v58  ;;  %v137_v19 = vstv %s442_s14 }
  0x2c   :  { %v141_v61 = vstv %s281_s15  ;;  %s287_s20 = sld [smem:[#allocation2 + $0x10]]  ;;  %v116_v62 = vmax.f32 %v115_v55, 0.0  ;;  %s246_s15 = sshll.u32 %s496_s2, 4  ;;  %s247_s15 = int_to_ptr.hbm [resolvable:$true] %s246_s15 }
  0x2d   :  { %v131_v63 = vadd.f32 %v130_v56, %v127_v57  ;;  %v142_v3 = vmul.f32 %v141_v61, %v406_v0  ;;  %v144_v4 = vstv %s282_s16  ;;  %s288_s21 = sld [smem:[#allocation2 + $0x1a]] }
  0x2e   :  { %v145_v6 = vmul.f32 %v144_v4, %v410_v1  ;;  %v148_v7 = vstv %s283_s17  ;;  %s457_s22 = sld [smem:[#allocation2 + $0x24]]  ;;  %v119_v12 = vmul.f32 %v118_v5, %v116_v62 }
  0x2f   :  { %v134_v8 = vadd.f32 %v133_v60, %v131_v63  ;;  %v149_v9 = vmul.f32 %v148_v7, %v412_v2  ;;  %s460_s1 = sld [smem:[#allocation2 + $0x2e]]  ;;  %v152_v13 = vstv %s448_s18 }
  0x30   :  { %v146_v10 = vadd.f32 %v145_v6, %v142_v3  ;;  %s291_s23 = sld [smem:[#allocation2 + $0x7]]  ;;  %v120_v24 = vadd.f32 %v119_v12, %v101_v11  ;;  %v156_v30 = vstv %s451_s19 }
  0x31   :  { %v160_v14 = vstv %s286_s0  ;;  %s292_s24 = sld [smem:[#allocation2 + $0x11]]  ;;  %v135_v15 = vmax.f32 %v134_v8, 0.0 }
  0x32   :  { %v150_v16 = vadd.f32 %v149_v9, %v146_v10  ;;  %v161_v17 = vmul.f32 %v160_v14, %v406_v0  ;;  %v163_v18 = vstv %s287_s20  ;;  %s293_s25 = sld [smem:[#allocation2 + $0x1b]] }
  0x33   :  { %v164_v20 = vmul.f32 %v163_v18, %v410_v1  ;;  %v167_v21 = vstv %s288_s21  ;;  %s466_s26 = sld [smem:[#allocation2 + $0x25]]  ;;  %v138_v26 = vmul.f32 %v137_v19, %v135_v15 }
  0x34   :  { %v153_v22 = vadd.f32 %v152_v13, %v150_v16  ;;  %v168_v23 = vmul.f32 %v167_v21, %v412_v2  ;;  %s469_s27 = sld [smem:[#allocation2 + $0x2f]]  ;;  %v171_v28 = vstv %s457_s22 }
  0x35   :  { %v165_v25 = vadd.f32 %v164_v20, %v161_v17  ;;  %s296_s28 = sld [smem:[#allocation2 + $0x8]]  ;;  %v139_v38 = vadd.f32 %v138_v26, %v120_v24  ;;  %v175_v42 = vstv %s460_s1 }
  0x36   :  { %v154_v27 = vmax.f32 %v153_v22, 0.0  ;;  %v179_v29 = vstv %s291_s23  ;;  %s297_s29 = sld [smem:[#allocation2 + $0x12]] }
  0x37   :  { %v169_v31 = vadd.f32 %v168_v23, %v165_v25  ;;  %v180_v32 = vmul.f32 %v179_v29, %v406_v0  ;;  %v182_v33 = vstv %s292_s24  ;;  %s298_s30 = sld [smem:[#allocation2 + $0x1c]] }
  0x38   :  { %v183_v34 = vmul.f32 %v182_v33, %v410_v1  ;;  %v186_v35 = vstv %s293_s25  ;;  %s475_s3 = sld [smem:[#allocation2 + $0x26]]  ;;  %v157_v39 = vmul.f32 %v156_v30, %v154_v27 }
  0x39   :  { %v172_v36 = vadd.f32 %v171_v28, %v169_v31  ;;  %v187_v37 = vmul.f32 %v186_v35, %v412_v2  ;;  %s478_s4 = sld [smem:[#allocation2 + $0x30]]  ;;  %v190_v43 = vstv %s466_s26 }
  0x3a   :  { %v184_v40 = vadd.f32 %v183_v34, %v180_v32  ;;  %s301_s5 = sld [smem:[#allocation2 + $0x9]]  ;;  %v158_v50 = vadd.f32 %v157_v39, %v139_v38  ;;  %v194_v54 = vstv %s469_s27 }
  0x3b   :  { %v173_v41 = vmax.f32 %v172_v36, 0.0  ;;  %v198_v44 = vstv %s296_s28  ;;  %s302_s6 = sld [smem:[#allocation2 + $0x13]] }
  0x3c   :  { %v188_v45 = vadd.f32 %v187_v37, %v184_v40  ;;  %v199_v46 = vmul.f32 %v198_v44, %v406_v0  ;;  %v201_v47 = vstv %s297_s29  ;;  %s303_s7 = sld [smem:[#allocation2 + $0x1d]] }
  0x3d   :  { %v202_v48 = vmul.f32 %v201_v47, %v410_v1  ;;  %v205_v49 = vstv %s298_s30  ;;  %s304_s8 = sld [smem:[#allocation2 + $0x27]]  ;;  %v176_v51 = vmul.f32 %v175_v42, %v173_v41 }
  0x3e   :  { %v191_v52 = vadd.f32 %v190_v43, %v188_v45  ;;  %v206_v53 = vmul.f32 %v205_v49, %v412_v2  ;;  %v209_v57 = vstv %s475_s3  ;;  %s305_s9 = sld [smem:[#allocation2 + $0x31]] }
  0x3f   :  { %v203_v55 = vadd.f32 %v202_v48, %v199_v46  ;;  %v177_v62 = vadd.f32 %v176_v51, %v158_v50  ;;  %v213_v7 = vstv %s478_s4  ;;  %s306_s10 = sld [smem:[#allocation2 + $0x32]] }
  0x40   :  { %v192_v56 = vmax.f32 %v191_v52, 0.0  ;;  %v217_v58 = vstv %s301_s5 }
  0x41   :  { %v207_v59 = vadd.f32 %v206_v53, %v203_v55  ;;  %v218_v60 = vmul.f32 %v217_v58, %v406_v0  ;;  %v220_v61 = vstv %s302_s6 }
  0x42   :  { %v195_v63 = vmul.f32 %v194_v54, %v192_v56  ;;  %v221_v3 = vmul.f32 %v220_v61, %v410_v1  ;;  %v224_v4 = vstv %s303_s7 }
  0x43   :  { %v210_v5 = vadd.f32 %v209_v57, %v207_v59  ;;  %v225_v6 = vmul.f32 %v224_v4, %v412_v2  ;;  %v228_v10 = vstv %s304_s8 }
  0x44   :  { %v222_v8 = vadd.f32 %v221_v3, %v218_v60  ;;  %v196_v11 = vadd.f32 %v195_v63, %v177_v62  ;;  %v232_v0 = vstv %s305_s9 }
  0x45   :  { %v211_v9 = vmax.f32 %v210_v5, 0.0  ;;  %v236_v18 = vstv %s306_s10 }
  0x46   :  { %v226_v12 = vadd.f32 %v225_v6, %v222_v8 }
  0x47   :  { %v214_v13 = vmul.f32 %v213_v7, %v211_v9 }
  0x48   :  { %v229_v14 = vadd.f32 %v228_v10, %v226_v12 }
  0x49   :  { %v215_v15 = vadd.f32 %v214_v13, %v196_v11 }
  0x4a   :  { %v230_v16 = vmax.f32 %v229_v14, 0.0 }
  0x4c   :  { %v233_v17 = vmul.f32 %v232_v0, %v230_v16 }
  0x4e   :  { %v234_v1 = vadd.f32 %v233_v17, %v215_v15 }
  0x50   :  { %v237_v2 = vadd.f32 %v236_v18, %v234_v1 }
  0x52   :  { %238 = vst [vmem:[#allocation7] sm:$0x1] %v237_v2 }
  0x53   :  { %249 = dma.vmem_to_hbm [thread:$0]  %s245_s12, 16, %s247_s15, [#allocation4]  }
  0x54   :  { %376 = dma.done.wait [#allocation4], 16  }
  0x55   :  { %377 = vsyncadd [#allocation4], 4294967280 }
  0x56   :  { %254 = vsyncpa [#allocation3], 1 }
  0x57   :  { %255 = vsyncpa [#allocation4], 1 }
  0x58   :  { %256 = vsyncpa [#allocation5], 1 }

</bundles_post_ra>
